<compile_context>
chip_gen: v7x
topology: tpu7x:2x2x1
jax: 0.10.0
libtpu: 0.0.40
codegen_flags: <defaults>
</compile_context>

<pallas_src>
import jax
import jax.numpy as jnp
from jax.experimental import pallas as pl
from jax.experimental.pallas import tpu as pltpu


def _avg_pool_kernel(vb_ref, emb_ref, mask_ref, out_ref, cnt_ref):
    # vb_ref  : (nb,)        int32 SMEM — valid S-block count per batch tile
    # emb_ref : (TB, TS, TH) native-dtype VMEM tile
    # mask_ref: (TB, TS, 1)  float32 VMEM tile
    # out_ref : (TB, TH)     float32 output tile (resident across the S axis)
    # cnt_ref : (TB, 1)      float32 scratch: running sum(mask)
    b = pl.program_id(0)
    s = pl.program_id(2)

    @pl.when(s == 0)
    def _init():
        out_ref[...] = jnp.zeros_like(out_ref)
        cnt_ref[...] = jnp.zeros_like(cnt_ref)

    # Skip sequence tiles that contain no valid token (right-padded ragged
    # batches): the index_map repeats the previous block (no re-DMA) and the
    # compute is gated off entirely.
    @pl.when(s < vb_ref[b])
    def _accumulate():
        emb = emb_ref[...]                                 # (TB, TS, TH)
        mask = mask_ref[...]                               # (TB, TS, 1) float32
        # 0/1 mask multiply in the embeddings' native dtype is exact; accumulate
        # in float32 for accuracy over long sequences.
        masked = emb * mask.astype(emb.dtype)
        out_ref[...] += jnp.sum(masked, axis=1, dtype=jnp.float32)
        cnt_ref[...] += jnp.sum(mask, axis=1)

    @pl.when(s == pl.num_programs(2) - 1)
    def _finalize():
        # Exact division: the epilogue is fully hidden behind the streaming DMA,
        # so the approximate reciprocal only cost accuracy. Matches torch.clamp.
        out_ref[...] = out_ref[...] / jnp.maximum(cnt_ref[...], 1e-9)


def _round_up(x, m):
    return (x + m - 1) // m * m


def _largest_aligned_divisor(dim, target, align=8):
    """Largest t <= target with dim % t == 0 and t % align == 0, else None."""
    t = (target // align) * align
    while t >= align:
        if dim % t == 0:
            return t
        t -= align
    return None


def average_pool(embeddings, attention_mask, *, emb_block_bytes=8 * 1024 * 1024):
    """Masked mean-pooling over the sequence axis (Pallas TPU kernel).

    embeddings:     (B, S, H) float
    attention_mask: (B, S)    numeric 0/1 mask
    returns:        (B, H)    float32
    """
    B, S, H = embeddings.shape
    itemsize = jnp.dtype(embeddings.dtype).itemsize

    # --- batch tiling (sublane dim of the output block: multiple of 8 or full B)
    if B <= 8:
        TB, B_pad = B, B
    elif B % 8 == 0:
        TB, B_pad = 8, B
    else:
        TB, B_pad = 8, _round_up(B, 8)
    nb = B_pad // TB

    # --- hidden tiling: give v7x's second TensorCore work when the batch axis
    #     has no parallelism. 128-multiple chunks keep stores lane-dense.
    if nb < 2 and H % 256 == 0:
        TH = H // 2
    else:
        TH = H
    nh = H // TH

    # --- sequence tiling: big streamed blocks (~emb_block_bytes). Prefer an
    #     8-aligned divisor of S (no padding copy); otherwise pad S with
    #     zero-mask rows — never fall back to a full-dimension (VMEM-busting) tile.
    ts_target = max(8, (emb_block_bytes // max(1, TB * TH * itemsize)) // 8 * 8)
    if S <= ts_target:
        TS, S_pad = S, S
    else:
        d = _largest_aligned_divisor(S, ts_target)
        if d is not None and d >= max(8, ts_target // 2):
            TS, S_pad = d, S
        else:
            TS = ts_target
            S_pad = _round_up(S, TS)
    ns = S_pad // TS

    # Mask as (B, S, 1) float32: S on sublanes, broadcast over H is free on the VPU.
    mask_f = attention_mask.astype(jnp.float32).reshape(B, S, 1)

    # Zero-pad only when the shape requires it (zero-mask rows are numerically free).
    if B_pad != B or S_pad != S:
        embeddings = jnp.pad(embeddings, ((0, B_pad - B), (0, S_pad - S), (0, 0)))
        mask_f = jnp.pad(mask_f, ((0, B_pad - B), (0, S_pad - S), (0, 0)))

    # Per-batch-tile count of S blocks that contain at least one valid token
    # (scalar-prefetched so index_maps and the kernel can skip padded tiles).
    tile_has = jnp.any(
        (mask_f[:, :, 0] != 0).reshape(nb, TB, ns, TS), axis=(1, 3))        # (nb, ns)
    valid_blocks = jnp.max(
        jnp.where(tile_has, jnp.arange(1, ns + 1, dtype=jnp.int32)[None, :], 0),
        axis=1).astype(jnp.int32)                                           # (nb,)

    def emb_index(b, h, s, vb_ref):
        s_eff = jnp.minimum(s, jnp.maximum(vb_ref[b] - 1, 0))
        return (b, s_eff, h)

    def mask_index(b, h, s, vb_ref):
        s_eff = jnp.minimum(s, jnp.maximum(vb_ref[b] - 1, 0))
        return (b, s_eff, 0)

    grid_spec = pltpu.PrefetchScalarGridSpec(
        num_scalar_prefetch=1,
        grid=(nb, nh, ns),                      # S (reduction) axis last
        in_specs=[
            pl.BlockSpec((TB, TS, TH), emb_index),
            pl.BlockSpec((TB, TS, 1), mask_index),
        ],
        # Same output block across the S axis -> resident float32 accumulator.
        out_specs=pl.BlockSpec((TB, TH), lambda b, h, s, vb_ref: (b, h)),
        scratch_shapes=[pltpu.VMEM((TB, 1), jnp.float32)],   # sum(mask)
    )

    # VMEM budget: double-buffered emb + mask blocks, out block, scratch + headroom.
    emb_blk = TB * TS * TH * itemsize
    mask_blk = TB * TS * 4
    out_blk = TB * TH * 4
    need = 2 * (emb_blk + mask_blk + out_blk) + TB * 4
    vmem_limit = int(min(48 << 20, max(32 << 20, need + (8 << 20))))

    out = pl.pallas_call(
        _avg_pool_kernel,
        out_shape=jax.ShapeDtypeStruct((B_pad, H), jnp.float32),
        grid_spec=grid_spec,
        compiler_params=pltpu.CompilerParams(
            # Batch / hidden tiles are independent -> shard across TCs on v7x;
            # S is the reduction axis -> "arbitrary".
            dimension_semantics=("parallel", "parallel", "arbitrary"),
            vmem_limit_bytes=vmem_limit,
        ),
    )(valid_blocks, embeddings, mask_f)

    return out[:B] if B_pad != B else out


if __name__ == "__main__":
    key = jax.random.PRNGKey(0)
    k1, k2, k3 = jax.random.split(key, 3)

    def ref_pool(emb, mask):
        m = mask[:, :, None].astype(jnp.float32)
        return jnp.sum(emb * m, axis=1) / jnp.clip(jnp.sum(m, axis=1), 1e-9)

    # Case 1: small, well-shaped inputs (the module's typical use).
    B, S, H = 2, 8, 32
    embeddings = jax.random.normal(k1, (B, S, H), dtype=jnp.float32)
    attention_mask = (jax.random.uniform(k2, (B, S)) > 0.3).astype(jnp.int32)
    out = jax.block_until_ready(average_pool(embeddings, attention_mask))
    assert out.shape == (B, H)
    ref = ref_pool(embeddings, attention_mask)
    assert jnp.allclose(out, ref, atol=1e-5, rtol=1e-5), float(jnp.max(jnp.abs(out - ref)))

    # Case 2: awkward shape + right-padded ragged mask (exercises zero-mask
    # padding, the scalar-prefetch tile-skip, and an all-masked row -> 0).
    B2, S2, H2 = 3, 50, 32
    emb2 = jax.random.normal(k3, (B2, S2, H2), dtype=jnp.float32)
    lens = jnp.array([10, 17, 0])
    mask2 = (jnp.arange(S2)[None, :] < lens[:, None]).astype(jnp.int32)
    out2 = jax.block_until_ready(average_pool(emb2, mask2, emb_block_bytes=2048))
    ref2 = ref_pool(emb2, mask2)
    assert out2.shape == (B2, H2)
    assert jnp.allclose(out2, ref2, atol=1e-5, rtol=1e-5), float(jnp.max(jnp.abs(out2 - ref2)))

    print("KERNEL_OK")
</pallas_src>

<mosaic_0001>
module attributes {stable_mosaic.version = 11 : i64} {
  func.func @_avg_pool_kernel(%arg0: i32, %arg1: i32, %arg2: i32, %arg3: memref<1xi32, #tpu.memory_space<smem>>, %arg4: memref<2x8x32xf32, #tpu.memory_space<vmem>>, %arg5: memref<2x8x1xf32, #tpu.memory_space<vmem>>, %arg6: memref<2x32xf32, #tpu.memory_space<vmem>>, %arg7: memref<2x1xf32, #tpu.memory_space<vmem>>) attributes {dimension_semantics = [#tpu.dimension_semantics<parallel>, #tpu.dimension_semantics<parallel>, #tpu.dimension_semantics<arbitrary>], iteration_bounds = array<i64: 1, 1, 1>, scalar_prefetch = 1 : i64, scratch_operands = 1 : i64, tpu.core_type = #tpu.core_type<tc>, window_params = [{transform_indices = @transform_0, window_bounds = array<i64: 2, 8, 32>}, {transform_indices = @transform_1, window_bounds = array<i64: 2, 8, 1>}, {transform_indices = @transform_2, window_bounds = array<i64: 2, 32>}]} {
    %c0_i32 = arith.constant 0 : i32
    %0 = arith.cmpi eq, %arg2, %c0_i32 : i32
    %1 = arith.extui %0 : i1 to i32
    %c0_i32_0 = arith.constant 0 : i32
    %2 = arith.cmpi ne, %1, %c0_i32_0 : i32
    scf.if %2 {
      %cst = arith.constant 0.000000e+00 : f32
      %11 = vector.broadcast %cst : f32 to vector<2x32xf32>
      %c0 = arith.constant 0 : index
      %c0_4 = arith.constant 0 : index
      %12 = vector.load %arg6[%c0, %c0_4] : memref<2x32xf32, #tpu.memory_space<vmem>>, vector<2x32xf32>
      tpu.vector_store %arg6[%c0, %c0_4], %11 {strides = array<i32>} : memref<2x32xf32, #tpu.memory_space<vmem>>, vector<2x32xf32>,
      %cst_5 = arith.constant 0.000000e+00 : f32
      %13 = vector.broadcast %cst_5 : f32 to vector<2x1xf32>
      %c0_6 = arith.constant 0 : index
      %c0_7 = arith.constant 0 : index
      %14 = vector.load %arg7[%c0_6, %c0_7] : memref<2x1xf32, #tpu.memory_space<vmem>>, vector<2x1xf32>
      tpu.vector_store %arg7[%c0_6, %c0_7], %13 {strides = array<i32>} : memref<2x1xf32, #tpu.memory_space<vmem>>, vector<2x1xf32>,
    } else {
    }
    %3 = arith.index_cast %arg0 : i32 to index
    %4 = memref.load %arg3[%3] : memref<1xi32, #tpu.memory_space<smem>>
    %5 = arith.cmpi slt, %arg2, %4 : i32
    %6 = arith.extui %5 : i1 to i32
    %c0_i32_1 = arith.constant 0 : i32
    %7 = arith.cmpi ne, %6, %c0_i32_1 : i32
    scf.if %7 {
      %c0 = arith.constant 0 : index
      %c0_4 = arith.constant 0 : index
      %c0_5 = arith.constant 0 : index
      %11 = vector.load %arg4[%c0, %c0_4, %c0_5] : memref<2x8x32xf32, #tpu.memory_space<vmem>>, vector<2x8x32xf32>
      %c0_6 = arith.constant 0 : index
      %c0_7 = arith.constant 0 : index
      %c0_8 = arith.constant 0 : index
      %12 = vector.load %arg5[%c0_6, %c0_7, %c0_8] : memref<2x8x1xf32, #tpu.memory_space<vmem>>, vector<2x8x1xf32>
      %13 = vector.broadcast %12 : vector<2x8x1xf32> to vector<2x8x32xf32>
      %14 = arith.mulf %11, %13 : vector<2x8x32xf32>
      %c0_9 = arith.constant 0 : index
      %c0_10 = arith.constant 0 : index
      %15 = vector.load %arg6[%c0_9, %c0_10] : memref<2x32xf32, #tpu.memory_space<vmem>>, vector<2x32xf32>
      %cst = arith.constant dense<0.000000e+00> : vector<2x32xf32>
      %16 = vector.multi_reduction <add>, %14, %cst [1] : vector<2x8x32xf32> to vector<2x32xf32>
      %17 = arith.addf %15, %16 : vector<2x32xf32>
      %c0_11 = arith.constant 0 : index
      %c0_12 = arith.constant 0 : index
      %18 = vector.load %arg6[%c0_11, %c0_12] : memref<2x32xf32, #tpu.memory_space<vmem>>, vector<2x32xf32>
      tpu.vector_store %arg6[%c0_11, %c0_12], %17 {strides = array<i32>} : memref<2x32xf32, #tpu.memory_space<vmem>>, vector<2x32xf32>,
      %c0_13 = arith.constant 0 : index
      %c0_14 = arith.constant 0 : index
      %19 = vector.load %arg7[%c0_13, %c0_14] : memref<2x1xf32, #tpu.memory_space<vmem>>, vector<2x1xf32>
      %cst_15 = arith.constant dense<0.000000e+00> : vector<2x1xf32>
      %20 = vector.multi_reduction <add>, %12, %cst_15 [1] : vector<2x8x1xf32> to vector<2x1xf32>
      %21 = arith.addf %19, %20 : vector<2x1xf32>
      %c0_16 = arith.constant 0 : index
      %c0_17 = arith.constant 0 : index
      %22 = vector.load %arg7[%c0_16, %c0_17] : memref<2x1xf32, #tpu.memory_space<vmem>>, vector<2x1xf32>
      tpu.vector_store %arg7[%c0_16, %c0_17], %21 {strides = array<i32>} : memref<2x1xf32, #tpu.memory_space<vmem>>, vector<2x1xf32>,
    } else {
    }
    %c0_i32_2 = arith.constant 0 : i32
    %8 = arith.cmpi eq, %arg2, %c0_i32_2 : i32
    %9 = arith.extui %8 : i1 to i32
    %c0_i32_3 = arith.constant 0 : i32
    %10 = arith.cmpi ne, %9, %c0_i32_3 : i32
    scf.if %10 {
      %c0 = arith.constant 0 : index
      %c0_4 = arith.constant 0 : index
      %11 = vector.load %arg6[%c0, %c0_4] : memref<2x32xf32, #tpu.memory_space<vmem>>, vector<2x32xf32>
      %c0_5 = arith.constant 0 : index
      %c0_6 = arith.constant 0 : index
      %12 = vector.load %arg7[%c0_5, %c0_6] : memref<2x1xf32, #tpu.memory_space<vmem>>, vector<2x1xf32>
      %cst = arith.constant 9.99999971E-10 : f32
      %13 = vector.broadcast %cst : f32 to vector<2x1xf32>
      %14 = arith.maximumf %12, %13 : vector<2x1xf32>
      %15 = vector.broadcast %14 : vector<2x1xf32> to vector<2x32xf32>
      %16 = arith.divf %11, %15 : vector<2x32xf32>
      %c0_7 = arith.constant 0 : index
      %c0_8 = arith.constant 0 : index
      %17 = vector.load %arg6[%c0_7, %c0_8] : memref<2x32xf32, #tpu.memory_space<vmem>>, vector<2x32xf32>
      tpu.vector_store %arg6[%c0_7, %c0_8], %16 {strides = array<i32>} : memref<2x32xf32, #tpu.memory_space<vmem>>, vector<2x32xf32>,
    } else {
    }
    return
  }
  func.func @transform_0(%arg0: i32, %arg1: i32, %arg2: i32, %arg3: memref<1xi32, #tpu.memory_space<smem>>) -> (i32, i32, i32) {
    %0 = arith.index_cast %arg0 : i32 to index
    %1 = memref.load %arg3[%0] : memref<1xi32, #tpu.memory_space<smem>>
    %c1_i32 = arith.constant 1 : i32
    %2 = arith.subi %1, %c1_i32 : i32
    %c0_i32 = arith.constant 0 : i32
    %3 = arith.maxsi %2, %c0_i32 : i32
    %4 = arith.minsi %arg2, %3 : i32
    %c0_i32_0 = arith.constant 0 : i32
    return %arg0, %4, %arg1 : i32, i32, i32
  }
  func.func @transform_1(%arg0: i32, %arg1: i32, %arg2: i32, %arg3: memref<1xi32, #tpu.memory_space<smem>>) -> (i32, i32, i32) {
    %0 = arith.index_cast %arg0 : i32 to index
    %1 = memref.load %arg3[%0] : memref<1xi32, #tpu.memory_space<smem>>
    %c1_i32 = arith.constant 1 : i32
    %2 = arith.subi %1, %c1_i32 : i32
    %c0_i32 = arith.constant 0 : i32
    %3 = arith.maxsi %2, %c0_i32 : i32
    %4 = arith.minsi %arg2, %3 : i32
    %c0_i32_0 = arith.constant 0 : i32
    %c0_i32_1 = arith.constant 0 : i32
    return %arg0, %4, %c0_i32_0 : i32, i32, i32
  }
  func.func @transform_2(%arg0: i32, %arg1: i32, %arg2: i32, %arg3: memref<1xi32, #tpu.memory_space<smem>>) -> (i32, i32) {
    %c0_i32 = arith.constant 0 : i32
    return %arg0, %arg1 : i32, i32
  }
}

</mosaic_0001>

<bundles_post_ra>
// kernel: tpu_custom_call.1
= control target key start
LH: loop header
LB: loop body
LE: loop exit
PB: predicated region body
PF: predicated region fallthrough
CT: control target
= control target key end

     0   :  { %9 = vsyncpa [#allocation6], 0  ;;  %vm102_vm0 = vcmask 254976   ;;  %vm104_vm1 = vcmask 1024   ;;  %v277_v0 = vmov 0.0   ;;  %s335_s0 = inlined_call_operand.<no memory space> [shape: s32[1], index: 0, kind: input, shape index: {}]   ;;  %s336_s1 = inlined_call_operand.vmem [shape: f32[2,8,32], index: 1, kind: input, shape index: {}]   ;;  %s337_s2 = inlined_call_operand.vmem [shape: f32[2,8,1], index: 2, kind: input, shape index: {}]   ;;  %s338_s3 = inlined_call_operand.hbm [shape: f32[2,32], index: 3, kind: output, shape index: {}]  }
   0x1   :  { %103 = vst.msk [vmem:[#allocation5] sm:$0x3] %vm102_vm0, %v277_v0  ;;  %p228_p0 = scmp.le.s32.totalorder %s335_s0, 0 }
   0x2   :  { %105 = vst.msk [vmem:[#allocation2] sm:$0x3] %vm104_vm1, %v277_v0  ;;  %v113_v1 = vld [vmem:[%s337_s2] sm:$0xff] (!%p228_p0)  ;;  %vm152_vm2 = vcmask (!%p228_p0), 7168   ;;  %v114_v2 = vld [vmem:[%s337_s2 + $0x8] sm:$0xff] (!%p228_p0)  ;;  %v278_v3 = vmov (!%p228_p0), 0  }
   0x3   :  { %110 = sbr.rel (%p228_p0) target bundleno = 155 (0x9b), region = 17  ;;  %249 = vset.pattern.permute.xlu0 (!%p228_p0), %v278_v3  ;;  %v153_v4 = vsel (!%p228_p0), %vm152_vm2, %v113_v1, 0.0  ;;  %v160_v5 = vsel (!%p228_p0), %vm152_vm2, %v114_v2, 0.0  ;;  %vm145_vm3 = vcmask (!%p228_p0), 1041409   ;;  %v111_v21 = vld [vmem:[%s336_s1] sm:$0xff] (!%p228_p0)  ;;  %vm128_vm4 = vcmask (!%p228_p0), 261120  }
   0x4   :  { %117 = vperm.xlu0 (!%p228_p0), %249, %v113_v1   ;;  %v154_v6 = vrot.slane (!%p228_p0), %v153_v4, 4  ;;  %v161_v7 = vrot.slane (!%p228_p0), %v160_v5, 4  ;;  %v112_v24 = vld [vmem:[%s336_s1 + $0x8] sm:$0xff] (!%p228_p0) }
   0x6   :  { %v155_v8 = vadd.f32 (!%p228_p0), %v154_v6, %v153_v4  ;;  %v162_v9 = vadd.f32 (!%p228_p0), %v161_v7, %v160_v5 }
   0x8   :  { %v156_v10 = vrot.slane (!%p228_p0), %v155_v8, 2  ;;  %v163_v11 = vrot.slane (!%p228_p0), %v162_v9, 2  ;;  %122 = vperm.xlu0 (!%p228_p0), %249, %v114_v2   ;;  %v127_v40 = vld [vmem:[#allocation5] sm:$0x3] (!%p228_p0) }
   0x9   :  { %v151_v17 = vld [vmem:[#allocation2] sm:$0x3] (!%p228_p0) }
   0xa   :  { %v157_v12 = vadd.f32 %v156_v10, %v155_v8  ;;  %v164_v13 = vadd.f32 %v163_v11, %v162_v9 }
   0xc   :  { %v158_v14 = vrot.slane %v157_v12, 1  ;;  %v165_v15 = vrot.slane %v164_v13, 1 }
   0xe   :  { %v159_v16 = vadd.f32 %v158_v14, %v157_v12  ;;  %v166_v18 = vadd.f32 %v165_v15, %v164_v13 }
  0x10   :  { %v169_v19 = vsel %vm145_vm3, %v166_v18, %v159_v16 }
  0x11   :  { %v171_v20 = vadd.f32 %v169_v19, %v151_v17 }
  0x13   :  { %173 = vst.msk [vmem:[#allocation2] sm:$0x3] %vm104_vm1, %v171_v20 }
  0x83   :  { %v118_v22 = vpop.permute.xlu0 %117 }
  0x84   :  { %v125_v23 = vmul.f32 %v118_v22, %v111_v21 }
  0x86   :  { %v129_v25 = vsel %vm128_vm4, %v125_v23, 0.0 }
  0x87   :  { %v130_v26 = vrot.slane %v129_v25, 4  ;;  %v123_v27 = vpop.permute.xlu0 %122 }
  0x88   :  { %v126_v28 = vmul.f32 %v123_v27, %v112_v24 }
  0x89   :  { %v131_v29 = vadd.f32 %v130_v26, %v129_v25 }
  0x8a   :  { %v136_v30 = vsel %vm128_vm4, %v126_v28, 0.0 }
  0x8b   :  { %v132_v31 = vrot.slane %v131_v29, 2  ;;  %v137_v32 = vrot.slane %v136_v30, 4 }
  0x8d   :  { %v133_v33 = vadd.f32 %v132_v31, %v131_v29  ;;  %v138_v34 = vadd.f32 %v137_v32, %v136_v30 }
  0x8f   :  { %v139_v35 = vrot.slane %v138_v34, 2  ;;  %v134_v36 = vrot.slane %v133_v33, 1 }
  0x91   :  { %v140_v37 = vadd.f32 %v139_v35, %v138_v34  ;;  %v135_v39 = vadd.f32 %v134_v36, %v133_v33 }
  0x93   :  { %v141_v38 = vrot.slane %v140_v37, 1 }
  0x95   :  { %v142_v41 = vadd.f32 %v141_v38, %v140_v37 }
  0x97   :  { %v146_v42 = vsel %vm145_vm3, %v142_v41, %v135_v39 }
  0x98   :  { %v148_v43 = vadd.f32 %v146_v42, %v127_v40 }
  0x9a   :  { %150 = vst.msk [vmem:[#allocation5] sm:$0x3] %vm102_vm0, %v148_v43 }
  0x9b PF:  { %v178_v44 = vld [vmem:[#allocation2] sm:$0x3]  ;;  %v279_v45 = vmov 0   ;;  %s280_s1 = smov [#allocation5]  }
  0x9c   :  { %250 = vset.pattern.permute.xlu0 %v279_v45  ;;  %v179_v46 = vmax.f32 %v178_v44, 1e-09  ;;  %s195_s20 = sshll.u32 %s280_s1, 4  ;;  %s196_s20 = int_to_ptr.vmem [resolvable:$true] %s195_s20 }
  0x9d   :  { %s253_s21 = scalar_lea.vmem %s196_s20, 32  ;;  %p258_p2 = scmp.lt.s32.totalorder %s196_s20, %s196_s20 }
  0x9e   :  { %182 = vperm.xlu0 %250, %v179_v46   ;;  %p254_p1 = scmp.ne.s32.totalorder %s196_s20, %s253_s21  ;;  %p259_p3 = scmp.lt.s32.totalorder %s253_s21, %s253_s21 }
  0xa0   :  { %p260_p4 = por %p259_p3, %p258_p2 }
  0xa1   :  { %v177_v48 = vld [vmem:[#allocation5] sm:$0x3] }
  0xa2   :  { %p261_p5 = pnand %p260_p4, %p254_p1 }
 0x11d   :  { %v183_v47 = vpop.permute.xlu0 %182 }
 0x11e   :  { %251 = vrcp.f32 %v183_v47 }
 0x128   :  { %v252_v49 = vpop.eup %251 }
 0x129   :  { %v186_v50 = vmul.f32 %v252_v49, %v177_v48 }
 0x12b   :  { %188 = vst.msk [vmem:[#allocation5] sm:$0x3] %vm102_vm0, %v186_v50 }
 0x12c   :  { %264 = shalt.err (!%p261_p5)
}
 0x12d   :  { %s265_s24 = scalar_lea.hbm %s338_s3, 32 }
 0x12e   :  { %p266_p6 = scmp.ne.s32.totalorder %s338_s3, %s265_s24  ;;  %p269_p7 = scmp.lt.u32.totalorder %s265_s24, %s338_s3 }
 0x130   :  { %p271_p8 = pnand %p269_p7, %p266_p6 }
 0x132   :  { %274 = shalt.err (!%p271_p8)
}
 0x133   :  { %198 = dma.vmem_to_hbm [thread:$0]  %s196_s20, 32, %s338_s3, [#allocation6]  }
 0x134   :  { %275 = dma.done.wait [#allocation6], 32  }
 0x135   :  { %276 = vsyncadd [#allocation6], 4294967264 }
 0x136   :  { %202 = vsyncpa [#allocation6], 1 }

</bundles_post_ra>
